<compile_context>
chip_gen: v7x
topology: tpu7x:2x2x1
jax: 0.10.0
libtpu: 0.0.40
codegen_flags: <defaults>
</compile_context>

<pallas_src>
import functools

import jax
import jax.numpy as jnp
from jax.experimental import pallas as pl
from jax.experimental.pallas import tpu as pltpu


def _pma_kernel(x_ref, a_ref, c_ref, wvo_ref, bo_ref, out_ref, *,
                num_heads, seq_len, num_seeds):
    """One batch block per grid step; weights are tiny and VMEM-resident."""
    rows, embed = x_ref.shape                # rows = bblk * N
    n, m, heads = seq_len, num_seeds, num_heads
    bblk = rows // n
    hm = heads * m

    x = x_ref[...]                                                    # (rows, E)

    # All-head, all-seed attention scores in ONE lane-dense matmul (query was
    # folded into the key projection on the host).
    sc = jnp.dot(x, a_ref[...], preferred_element_type=jnp.float32) + c_ref[...]
    sc = sc.reshape(bblk, n, hm)             # leading-dim split only (free)

    # Softmax over keys (axis=1).
    sc = sc - jnp.max(sc, axis=1, keepdims=True)
    p = jnp.exp(sc)
    p = p * pl.reciprocal(jnp.sum(p, axis=1, keepdims=True), approx=True)
    p = p.astype(x.dtype)                                             # (bblk, N, H*M)

    x3 = x.reshape(bblk, n, embed)                                    # (bblk, N, E)

    # Value + output projection, fused per head: acc += (p_h^T x) @ Wvo_h.
    # Start the f32 accumulator from the (bv-folded) output bias.
    acc = jnp.broadcast_to(bo_ref[...], (bblk * m, embed)).astype(jnp.float32)
    for h in range(heads):                   # small static unroll, tiny body
        ph = p[:, :, h * m:(h + 1) * m]                               # (bblk, N, M)
        u_h = jnp.einsum('bnm,bne->bme', ph, x3,
                         preferred_element_type=jnp.float32)          # (bblk, M, E)
        acc = acc + jnp.dot(
            u_h.reshape(bblk * m, embed).astype(wvo_ref.dtype),
            wvo_ref[h], preferred_element_type=jnp.float32)           # (bblk*M, E)

    out_ref[...] = acc.astype(out_ref.dtype)


def _vmem_config():
    """Generation-aware VMEM sizing: v5e/v6e have 128 MiB physical VMEM (32 MiB
    scoped default), v7x only 64 MiB shared by two TensorCores."""
    cap = 128 * 1024 * 1024
    try:
        cap = int(getattr(pltpu.get_tpu_info(), "vmem_capacity_bytes", cap)) or cap
    except Exception:
        pass
    budget = min(cap // 4, 48 * 1024 * 1024)   # per-grid-step working-set target
    limit = min(cap // 2, 96 * 1024 * 1024)    # scoped-VMEM ceiling for Mosaic
    return budget, limit


def _choose_batch_block(B, N, M, E, H, x_itemsize, vmem_budget_bytes):
    """Largest batch block that (a) keeps the X and output blocks' second-to-last
    dims 8-aligned (or full-array), (b) fits the per-step VMEM budget, and
    (c) leaves the grid with >= 2 steps so the 'parallel' axis can occupy both
    v7x TensorCores.  Falls back to the full batch (full-array blocks are
    always legal)."""
    hm = H * M
    f32 = 4

    def valid(bb):
        x_ok = (bb * N) % 8 == 0 or bb == B
        o_ok = (bb * M) % 8 == 0 or bb == B
        return x_ok and o_ok

    def bytes_needed(bb):
        rows = bb * N
        return (2 * rows * E * x_itemsize          # streamed X block (double-buffered)
                + 2 * bb * M * E * f32             # output block (double-buffered)
                + 2 * rows * hm * f32              # scores + softmax weights (f32)
                + 2 * bb * M * E * f32             # u_h + f32 accumulator
                + (E * hm + hm + H * E * E + E) * f32)   # resident A, c, Wvo, bo

    for bb in sorted((d for d in range(1, B) if B % d == 0), reverse=True):
        if valid(bb) and bytes_needed(bb) <= vmem_budget_bytes:
            return bb
    return B


def pma_forward(X, S, in_proj_weight, in_proj_bias, out_proj_weight,
                out_proj_bias, num_heads, *, compute_dtype=jnp.bfloat16):
    """Pallas PMA forward.  X: (B, N, E) -> (B, num_seeds, E)."""
    B, N, E = X.shape
    M = S.shape[1]                            # num_seeds
    H = num_heads
    assert E % H == 0
    D = E // H
    HM = H * M
    f32 = jnp.float32

    wq = in_proj_weight[:E].astype(f32)
    wk = in_proj_weight[E:2 * E].astype(f32)
    wv = in_proj_weight[2 * E:].astype(f32)
    bq = in_proj_bias[:E].astype(f32)
    bk = in_proj_bias[E:2 * E].astype(f32)
    bv = in_proj_bias[2 * E:].astype(f32)
    wo = out_proj_weight.astype(f32)
    bo = out_proj_bias.astype(f32)

    # Batch-independent query with the 1/sqrt(head_dim) softmax scale folded in.
    q_scaled = (S.reshape(M, E).astype(f32) @ wq.T + bq) * (D ** -0.5)   # (M, E)
    q3 = q_scaled.reshape(M, H, D)

    # Fold the query into the key projection:
    #   scores[b, n, h*M+m] = x[b, n] @ A[:, h*M+m] + c[h*M+m]
    a = jnp.einsum('hde,mhd->ehm', wk.reshape(H, D, E), q3).reshape(E, HM)
    c = jnp.einsum('mhd,hd->hm', q3, bk.reshape(H, D)).reshape(1, HM)

    # Fold the output projection into the value projection (per head), and the
    # bv contribution (sum_n softmax == 1) into the output bias.
    wvo = jnp.einsum('hde,fhd->hef', wv.reshape(H, D, E),
                     wo.reshape(E, H, D))                              # (H, E, E)
    bo_eff = (bo + bv @ wo.T).reshape(1, E)

    x_itemsize = jnp.dtype(compute_dtype).itemsize
    vmem_budget, vmem_limit = _vmem_config()
    bblk = _choose_batch_block(B, N, M, E, H, x_itemsize, vmem_budget)
    steps = B // bblk

    # bf16 operands halve the streamed-X HBM traffic and use the fast MXU path;
    # all accumulation stays f32 inside the kernel.
    x2 = X.reshape(B * N, E).astype(compute_dtype)
    a = a.astype(compute_dtype)
    wvo = wvo.astype(compute_dtype)

    kernel = functools.partial(_pma_kernel, num_heads=H, seq_len=N, num_seeds=M)
    rep = lambda shape: pl.BlockSpec(shape, lambda i: (0,) * len(shape))

    out2 = pl.pallas_call(
        kernel,
        out_shape=jax.ShapeDtypeStruct((B * M, E), X.dtype),
        grid_spec=pl.GridSpec(
            grid=(steps,),
            in_specs=[
                # The only streamed operand.  (If its DMA is still exposed on
                # large shapes, add pipeline_mode=pl.Buffered(3) here.)
                pl.BlockSpec((bblk * N, E), lambda i: (i, 0)),
                rep((E, HM)),                 # A   : query folded into Wk
                rep((1, HM)),                 # c   : q . bk
                rep((H, E, E)),               # Wvo : Wv fused with Wo, per head
                rep((1, E)),                  # bo + bv @ Wo^T
            ],
            out_specs=pl.BlockSpec((bblk * M, E), lambda i: (i, 0)),
        ),
        compiler_params=pltpu.CompilerParams(
            dimension_semantics=("parallel",),        # batch axis shards over TCs
            vmem_limit_bytes=vmem_limit),
    )(x2, a, c, wvo, bo_eff)

    return out2.reshape(B, M, E)


def pma_reference(X, S, in_proj_weight, in_proj_bias, out_proj_weight,
                  out_proj_bias, num_heads):
    """Pure-JAX reference mirroring nn.MultiheadAttention (no mask), f32."""
    B, N, E = X.shape
    M = S.shape[1]
    D = E // num_heads
    wq, wk, wv = in_proj_weight[:E], in_proj_weight[E:2 * E], in_proj_weight[2 * E:]
    bq, bk, bv = in_proj_bias[:E], in_proj_bias[E:2 * E], in_proj_bias[2 * E:]
    q = jnp.einsum('bme,fe->bmf', jnp.broadcast_to(S, (B, M, E)), wq) + bq
    k = jnp.einsum('bne,fe->bnf', X, wk) + bk
    v = jnp.einsum('bne,fe->bnf', X, wv) + bv
    q = q.reshape(B, M, num_heads, D).transpose(0, 2, 1, 3)
    k = k.reshape(B, N, num_heads, D).transpose(0, 2, 1, 3)
    v = v.reshape(B, N, num_heads, D).transpose(0, 2, 1, 3)
    sc = jnp.einsum('bhmd,bhnd->bhmn', q, k) / jnp.sqrt(jnp.float32(D))
    p = jax.nn.softmax(sc, axis=-1)
    o = jnp.einsum('bhmn,bhnd->bhmd', p, v).transpose(0, 2, 1, 3).reshape(B, M, E)
    return jnp.einsum('bme,fe->bmf', o, out_proj_weight) + out_proj_bias


def _xavier_uniform(key, shape, fan_in, fan_out, dtype=jnp.float32):
    limit = (6.0 / (fan_in + fan_out)) ** 0.5
    return jax.random.uniform(key, shape, dtype, minval=-limit, maxval=limit)


if __name__ == "__main__":
    # Small shapes consistent with the module.
    B, N, E = 2, 8, 32            # batch, sequence length, embed_dim
    num_heads = 4
    num_seeds = 4

    key = jax.random.PRNGKey(0)
    k_s, k_in, k_out, k_b1, k_b2, k_x = jax.random.split(key, 6)

    # Deterministic parameter init (PyTorch shapes; xavier-style weights,
    # small random biases so the bias-fusion paths are actually exercised).
    S = _xavier_uniform(k_s, (1, num_seeds, E), num_seeds, E)          # nn.Parameter
    in_proj_weight = _xavier_uniform(k_in, (3 * E, E), E, 3 * E)       # (3E, E)
    in_proj_bias = 0.1 * jax.random.normal(k_b1, (3 * E,), jnp.float32)
    out_proj_weight = _xavier_uniform(k_out, (E, E), E, E)             # (E, E)
    out_proj_bias = 0.1 * jax.random.normal(k_b2, (E,), jnp.float32)

    X = jax.random.normal(k_x, (B, N, E), jnp.float32)

    out = pma_forward(X, S, in_proj_weight, in_proj_bias,
                      out_proj_weight, out_proj_bias, num_heads)
    out = jax.block_until_ready(out)

    ref = pma_reference(X, S, in_proj_weight, in_proj_bias,
                        out_proj_weight, out_proj_bias, num_heads)
    assert out.shape == (B, num_seeds, E)
    # Tolerance accounts for bf16 operands (f32 accumulation) and the
    # approximate EUP reciprocal in the softmax denominator.
    assert jnp.allclose(out, ref, atol=2e-2, rtol=2e-2), "mismatch vs. reference"

    print("KERNEL_OK")
</pallas_src>

<mosaic_0001>
module attributes {stable_mosaic.version = 11 : i64} {
  func.func @_pma_kernel(%arg0: i32, %arg1: memref<16x32xbf16, #tpu.memory_space<vmem>>, %arg2: memref<32x16xbf16, #tpu.memory_space<vmem>>, %arg3: memref<1x16xf32, #tpu.memory_space<vmem>>, %arg4: memref<4x32x32xbf16, #tpu.memory_space<vmem>>, %arg5: memref<1x32xf32, #tpu.memory_space<vmem>>, %arg6: memref<8x32xf32, #tpu.memory_space<vmem>>) attributes {dimension_semantics = [#tpu.dimension_semantics<parallel>], iteration_bounds = array<i64: 1>, scalar_prefetch = 0 : i64, scratch_operands = 0 : i64, tpu.core_type = #tpu.core_type<tc>, window_params = [{transform_indices = @transform_0, window_bounds = array<i64: 16, 32>}, {pipeline_mode = #tpu.pipeline_mode<synchronous>, transform_indices = @transform_1, window_bounds = array<i64: 32, 16>}, {pipeline_mode = #tpu.pipeline_mode<synchronous>, transform_indices = @transform_2, window_bounds = array<i64: 1, 16>}, {pipeline_mode = #tpu.pipeline_mode<synchronous>, transform_indices = @transform_3, window_bounds = array<i64: 4, 32, 32>}, {pipeline_mode = #tpu.pipeline_mode<synchronous>, transform_indices = @transform_4, window_bounds = array<i64: 1, 32>}, {transform_indices = @transform_5, window_bounds = array<i64: 8, 32>}]} {
    %c0 = arith.constant 0 : index
    %c0_0 = arith.constant 0 : index
    %0 = vector.load %arg1[%c0, %c0_0] : memref<16x32xbf16, #tpu.memory_space<vmem>>, vector<16x32xbf16>
    %c0_1 = arith.constant 0 : index
    %c0_2 = arith.constant 0 : index
    %1 = vector.load %arg2[%c0_1, %c0_2] : memref<32x16xbf16, #tpu.memory_space<vmem>>, vector<32x16xbf16>
    %cst = arith.constant dense<0.000000e+00> : vector<16x16xf32>
    %2 = tpu.matmul %0, %1, %cst {dimension_numbers = #tpu.dot_dimension_numbers<[1], [0], [0], [1], [0, 0, 1, 1], [], []>} : vector<16x32xbf16>, vector<32x16xbf16>, vector<16x16xf32> -> vector<16x16xf32>
    %c0_3 = arith.constant 0 : index
    %c0_4 = arith.constant 0 : index
    %3 = vector.load %arg3[%c0_3, %c0_4] : memref<1x16xf32, #tpu.memory_space<vmem>>, vector<1x16xf32>
    %4 = vector.broadcast %3 : vector<1x16xf32> to vector<16x16xf32>
    %5 = arith.addf %2, %4 : vector<16x16xf32>
    %6 = vector.shape_cast %5 : vector<16x16xf32> to vector<2x8x16xf32>
    %cst_5 = arith.constant dense<0xFF800000> : vector<2x16xf32>
    %7 = vector.multi_reduction <maximumf>, %6, %cst_5 [1] : vector<2x8x16xf32> to vector<2x16xf32>
    %8 = vector.shape_cast %7 : vector<2x16xf32> to vector<2x1x16xf32>
    %9 = vector.broadcast %8 : vector<2x1x16xf32> to vector<2x8x16xf32>
    %10 = arith.subf %6, %9 : vector<2x8x16xf32>
    %11 = math.exp %10 : vector<2x8x16xf32>
    %cst_6 = arith.constant dense<0.000000e+00> : vector<2x16xf32>
    %12 = vector.multi_reduction <add>, %11, %cst_6 [1] : vector<2x8x16xf32> to vector<2x16xf32>
    %13 = vector.shape_cast %12 : vector<2x16xf32> to vector<2x1x16xf32>
    %14 = tpu.reciprocal %13 {approx = true} : vector<2x1x16xf32> -> vector<2x1x16xf32>
    %15 = vector.broadcast %14 : vector<2x1x16xf32> to vector<2x8x16xf32>
    %16 = arith.mulf %11, %15 : vector<2x8x16xf32>
    %17 = arith.truncf %16 : vector<2x8x16xf32> to vector<2x8x16xbf16>
    %18 = vector.shape_cast %0 : vector<16x32xbf16> to vector<2x8x32xbf16>
    %c0_7 = arith.constant 0 : index
    %c0_8 = arith.constant 0 : index
    %19 = vector.load %arg5[%c0_7, %c0_8] : memref<1x32xf32, #tpu.memory_space<vmem>>, vector<1x32xf32>
    %20 = vector.shape_cast %19 : vector<1x32xf32> to vector<1x32xf32>
    %21 = vector.broadcast %20 : vector<1x32xf32> to vector<8x32xf32>
    %22 = vector.extract_strided_slice %17 {offsets = [0, 0, 0], sizes = [2, 8, 4], strides = [1, 1, 1]} : vector<2x8x16xbf16> to vector<2x8x4xbf16>
    "tpu.trace_start"() <{level = 10 : i32, message = "bnm,bne->bme"}> : () -> ()
    %cst_9 = arith.constant dense<0.000000e+00> : vector<2x4x32xf32>
    %23 = tpu.matmul %22, %18, %cst_9 {dimension_numbers = #tpu.dot_dimension_numbers<[1], [1], [2], [2], [0, 0, 0, 2, 1, 2], [0], [0]>} : vector<2x8x4xbf16>, vector<2x8x32xbf16>, vector<2x4x32xf32> -> vector<2x4x32xf32>
    "tpu.trace_stop"() : () -> ()
    %24 = vector.shape_cast %23 : vector<2x4x32xf32> to vector<8x32xf32>
    %25 = arith.truncf %24 : vector<8x32xf32> to vector<8x32xbf16>
    %c0_10 = arith.constant 0 : index
    %c0_11 = arith.constant 0 : index
    %c0_12 = arith.constant 0 : index
    %26 = vector.load %arg4[%c0_10, %c0_11, %c0_12] : memref<4x32x32xbf16, #tpu.memory_space<vmem>>, vector<1x32x32xbf16>
    %27 = vector.shape_cast %26 : vector<1x32x32xbf16> to vector<32x32xbf16>
    %cst_13 = arith.constant dense<0.000000e+00> : vector<8x32xf32>
    %28 = tpu.matmul %25, %27, %cst_13 {dimension_numbers = #tpu.dot_dimension_numbers<[1], [0], [0], [1], [0, 0, 1, 1], [], []>} : vector<8x32xbf16>, vector<32x32xbf16>, vector<8x32xf32> -> vector<8x32xf32>
    %29 = arith.addf %21, %28 : vector<8x32xf32>
    %30 = vector.extract_strided_slice %17 {offsets = [0, 0, 4], sizes = [2, 8, 4], strides = [1, 1, 1]} : vector<2x8x16xbf16> to vector<2x8x4xbf16>
    "tpu.trace_start"() <{level = 10 : i32, message = "bnm,bne->bme"}> : () -> ()
    %cst_14 = arith.constant dense<0.000000e+00> : vector<2x4x32xf32>
    %31 = tpu.matmul %30, %18, %cst_14 {dimension_numbers = #tpu.dot_dimension_numbers<[1], [1], [2], [2], [0, 0, 0, 2, 1, 2], [0], [0]>} : vector<2x8x4xbf16>, vector<2x8x32xbf16>, vector<2x4x32xf32> -> vector<2x4x32xf32>
    "tpu.trace_stop"() : () -> ()
    %32 = vector.shape_cast %31 : vector<2x4x32xf32> to vector<8x32xf32>
    %33 = arith.truncf %32 : vector<8x32xf32> to vector<8x32xbf16>
    %c1 = arith.constant 1 : index
    %c0_15 = arith.constant 0 : index
    %c0_16 = arith.constant 0 : index
    %34 = vector.load %arg4[%c1, %c0_15, %c0_16] : memref<4x32x32xbf16, #tpu.memory_space<vmem>>, vector<1x32x32xbf16>
    %35 = vector.shape_cast %34 : vector<1x32x32xbf16> to vector<32x32xbf16>
    %cst_17 = arith.constant dense<0.000000e+00> : vector<8x32xf32>
    %36 = tpu.matmul %33, %35, %cst_17 {dimension_numbers = #tpu.dot_dimension_numbers<[1], [0], [0], [1], [0, 0, 1, 1], [], []>} : vector<8x32xbf16>, vector<32x32xbf16>, vector<8x32xf32> -> vector<8x32xf32>
    %37 = arith.addf %29, %36 : vector<8x32xf32>
    %38 = vector.extract_strided_slice %17 {offsets = [0, 0, 8], sizes = [2, 8, 4], strides = [1, 1, 1]} : vector<2x8x16xbf16> to vector<2x8x4xbf16>
    "tpu.trace_start"() <{level = 10 : i32, message = "bnm,bne->bme"}> : () -> ()
    %cst_18 = arith.constant dense<0.000000e+00> : vector<2x4x32xf32>
    %39 = tpu.matmul %38, %18, %cst_18 {dimension_numbers = #tpu.dot_dimension_numbers<[1], [1], [2], [2], [0, 0, 0, 2, 1, 2], [0], [0]>} : vector<2x8x4xbf16>, vector<2x8x32xbf16>, vector<2x4x32xf32> -> vector<2x4x32xf32>
    "tpu.trace_stop"() : () -> ()
    %40 = vector.shape_cast %39 : vector<2x4x32xf32> to vector<8x32xf32>
    %41 = arith.truncf %40 : vector<8x32xf32> to vector<8x32xbf16>
    %c2 = arith.constant 2 : index
    %c0_19 = arith.constant 0 : index
    %c0_20 = arith.constant 0 : index
    %42 = vector.load %arg4[%c2, %c0_19, %c0_20] : memref<4x32x32xbf16, #tpu.memory_space<vmem>>, vector<1x32x32xbf16>
    %43 = vector.shape_cast %42 : vector<1x32x32xbf16> to vector<32x32xbf16>
    %cst_21 = arith.constant dense<0.000000e+00> : vector<8x32xf32>
    %44 = tpu.matmul %41, %43, %cst_21 {dimension_numbers = #tpu.dot_dimension_numbers<[1], [0], [0], [1], [0, 0, 1, 1], [], []>} : vector<8x32xbf16>, vector<32x32xbf16>, vector<8x32xf32> -> vector<8x32xf32>
    %45 = arith.addf %37, %44 : vector<8x32xf32>
    %46 = vector.extract_strided_slice %17 {offsets = [0, 0, 12], sizes = [2, 8, 4], strides = [1, 1, 1]} : vector<2x8x16xbf16> to vector<2x8x4xbf16>
    "tpu.trace_start"() <{level = 10 : i32, message = "bnm,bne->bme"}> : () -> ()
    %cst_22 = arith.constant dense<0.000000e+00> : vector<2x4x32xf32>
    %47 = tpu.matmul %46, %18, %cst_22 {dimension_numbers = #tpu.dot_dimension_numbers<[1], [1], [2], [2], [0, 0, 0, 2, 1, 2], [0], [0]>} : vector<2x8x4xbf16>, vector<2x8x32xbf16>, vector<2x4x32xf32> -> vector<2x4x32xf32>
    "tpu.trace_stop"() : () -> ()
    %48 = vector.shape_cast %47 : vector<2x4x32xf32> to vector<8x32xf32>
    %49 = arith.truncf %48 : vector<8x32xf32> to vector<8x32xbf16>
    %c3 = arith.constant 3 : index
    %c0_23 = arith.constant 0 : index
    %c0_24 = arith.constant 0 : index
    %50 = vector.load %arg4[%c3, %c0_23, %c0_24] : memref<4x32x32xbf16, #tpu.memory_space<vmem>>, vector<1x32x32xbf16>
    %51 = vector.shape_cast %50 : vector<1x32x32xbf16> to vector<32x32xbf16>
    %cst_25 = arith.constant dense<0.000000e+00> : vector<8x32xf32>
    %52 = tpu.matmul %49, %51, %cst_25 {dimension_numbers = #tpu.dot_dimension_numbers<[1], [0], [0], [1], [0, 0, 1, 1], [], []>} : vector<8x32xbf16>, vector<32x32xbf16>, vector<8x32xf32> -> vector<8x32xf32>
    %53 = arith.addf %45, %52 : vector<8x32xf32>
    %c0_26 = arith.constant 0 : index
    %c0_27 = arith.constant 0 : index
    %54 = vector.load %arg6[%c0_26, %c0_27] : memref<8x32xf32, #tpu.memory_space<vmem>>, vector<8x32xf32>
    tpu.vector_store %arg6[%c0_26, %c0_27], %53 {strides = array<i32>} : memref<8x32xf32, #tpu.memory_space<vmem>>, vector<8x32xf32>,
    return
  }
  func.func @transform_0(%arg0: i32) -> (i32, i32) {
    %c0_i32 = arith.constant 0 : i32
    %c0_i32_0 = arith.constant 0 : i32
    return %arg0, %c0_i32 : i32, i32
  }
  func.func @transform_1(%arg0: i32) -> (i32, i32) {
    %c0_i32 = arith.constant 0 : i32
    %c0_i32_0 = arith.constant 0 : i32
    %c0_i32_1 = arith.constant 0 : i32
    return %c0_i32, %c0_i32_0 : i32, i32
  }
  func.func @transform_2(%arg0: i32) -> (i32, i32) {
    %c0_i32 = arith.constant 0 : i32
    %c0_i32_0 = arith.constant 0 : i32
    %c0_i32_1 = arith.constant 0 : i32
    return %c0_i32, %c0_i32_0 : i32, i32
  }
  func.func @transform_3(%arg0: i32) -> (i32, i32, i32) {
    %c0_i32 = arith.constant 0 : i32
    %c0_i32_0 = arith.constant 0 : i32
    %c0_i32_1 = arith.constant 0 : i32
    %c0_i32_2 = arith.constant 0 : i32
    return %c0_i32, %c0_i32_0, %c0_i32_1 : i32, i32, i32
  }
  func.func @transform_4(%arg0: i32) -> (i32, i32) {
    %c0_i32 = arith.constant 0 : i32
    %c0_i32_0 = arith.constant 0 : i32
    %c0_i32_1 = arith.constant 0 : i32
    return %c0_i32, %c0_i32_0 : i32, i32
  }
  func.func @transform_5(%arg0: i32) -> (i32, i32) {
    %c0_i32 = arith.constant 0 : i32
    %c0_i32_0 = arith.constant 0 : i32
    return %arg0, %c0_i32 : i32, i32
  }
}

</mosaic_0001>

<bundles_post_ra>
// kernel: tpu_custom_call.1
= control target key start
LH: loop header
LB: loop body
LE: loop exit
PB: predicated region body
PF: predicated region fallthrough
CT: control target
= control target key end

     0   :  { %10 = vsyncpa [#allocation3], 0  ;;  %s1525_s0 = inlined_call_operand.hbm [shape: bf16[16,32], index: 0, kind: input, shape index: {}]   ;;  %s1526_s1 = inlined_call_operand.hbm [shape: bf16[32,16], index: 1, kind: input, shape index: {}]   ;;  %s1527_s2 = inlined_call_operand.hbm [shape: f32[1,16], index: 2, kind: input, shape index: {}]   ;;  %s1528_s3 = inlined_call_operand.hbm [shape: bf16[4,32,32], index: 3, kind: input, shape index: {}]   ;;  %s1529_s4 = inlined_call_operand.hbm [shape: f32[1,32], index: 4, kind: input, shape index: {}]   ;;  %s1530_s5 = inlined_call_operand.hbm [shape: f32[8,32], index: 5, kind: output, shape index: {}]  }
   0x1   :  { %11 = vsyncpa [#allocation6], 0 }
   0x2   :  { %12 = vsyncpa [#allocation9], 0 }
   0x3   :  { %13 = vsyncpa [#allocation4], 0  ;;  %s1318_s18 = smov [#allocation5]   ;;  %s1319_s20 = smov [#allocation8]  }
   0x4   :  { %s31_s19 = sshll.u32 %s1318_s18, 4  ;;  %s53_s21 = sshll.u32 %s1319_s20, 4  ;;  %s32_s19 = int_to_ptr.vmem [resolvable:$true] %s31_s19  ;;  %s1361_s21 = int_to_ptr.vmem [resolvable:$true] %s53_s21 }
   0x5   :  { %s1178_s24 = scalar_lea.hbm %s1526_s1, 256 }
   0x6   :  { %p1179_p0 = scmp.ne.s32.totalorder %s1526_s1, %s1178_s24  ;;  %p1182_p1 = scmp.lt.u32.totalorder %s1178_s24, %s1526_s1 }
   0x8   :  { %p1184_p2 = pnand %p1182_p1, %p1179_p0 }
   0xa   :  { %1187 = shalt.err (!%p1184_p2)
}
   0xb   :  { %s1188_s29 = scalar_lea.vmem %s32_s19, 256  ;;  %p1193_p4 = scmp.lt.s32.totalorder %s32_s19, %s32_s19 }
   0xc   :  { %p1189_p3 = scmp.ne.s32.totalorder %s32_s19, %s1188_s29  ;;  %p1194_p5 = scmp.lt.s32.totalorder %s1188_s29, %s1188_s29 }
   0xe   :  { %p1195_p6 = por %p1194_p5, %p1193_p4 }
  0x10   :  { %p1196_p7 = pnand %p1195_p6, %p1189_p3 }
  0x12   :  { %1199 = shalt.err (!%p1196_p7)
}
  0x13   :  { %s1320_s30 = smov 64   ;;  %s1321_s6 = smov 4  }
  0x14   :  { %37 = dma.hbm_to_vmem [thread:$0]  %s1526_s1, 256, %s32_s19, [#allocation6], %s1320_s30, %s1320_s30, %s1321_s6  }
  0x15   :  { %s1200_s11 = scalar_lea.hbm %s1528_s3, 1024 }
  0x16   :  { %p1201_p8 = scmp.ne.s32.totalorder %s1528_s3, %s1200_s11  ;;  %p1204_p9 = scmp.lt.u32.totalorder %s1200_s11, %s1528_s3 }
  0x18   :  { %p1206_p10 = pnand %p1204_p9, %p1201_p8 }
  0x1a   :  { %1209 = shalt.err (!%p1206_p10)
}
  0x1b   :  { %s1210_s16 = scalar_lea.vmem %s1361_s21, 1024  ;;  %p1215_p12 = scmp.lt.s32.totalorder %s1361_s21, %s1361_s21 }
  0x1c   :  { %p1211_p11 = scmp.ne.s32.totalorder %s1361_s21, %s1210_s16  ;;  %p1216_p13 = scmp.lt.s32.totalorder %s1210_s16, %s1210_s16 }
  0x1e   :  { %p1217_p0 = por %p1216_p13, %p1215_p12 }
  0x20   :  { %p1218_p1 = pnand %p1217_p0, %p1211_p11 }
  0x22   :  { %1221 = shalt.err (!%p1218_p1)
}
  0x23   :  { %59 = dma.hbm_to_vmem [thread:$0]  %s1528_s3, 1024, %s1361_s21, [#allocation9], %s1320_s30, %s1320_s30, %s1321_s6  }
  0x24   :  { %s1322_s18 = smov [#allocation2]   ;;  %s1323_s20 = smov [#allocation7]  }
  0x25   :  { %s19_s19 = sshll.u32 %s1322_s18, 4  ;;  %s44_s22 = sshll.u32 %s1323_s20, 4  ;;  %s20_s19 = int_to_ptr.vmem [resolvable:$true] %s19_s19  ;;  %s45_s22 = int_to_ptr.vmem [resolvable:$true] %s44_s22 }
  0x26   :  { %s1222_s25 = scalar_lea.hbm %s1525_s0, 128 }
  0x27   :  { %p1223_p2 = scmp.ne.s32.totalorder %s1525_s0, %s1222_s25  ;;  %p1226_p3 = scmp.lt.u32.totalorder %s1222_s25, %s1525_s0 }
  0x29   :  { %p1228_p4 = pnand %p1226_p3, %p1223_p2 }
  0x2b   :  { %1231 = shalt.err (!%p1228_p4)
}
  0x2c   :  { %s1232_s3 = scalar_lea.vmem %s20_s19, 128  ;;  %p1237_p6 = scmp.lt.s32.totalorder %s20_s19, %s20_s19 }
  0x2d   :  { %p1233_p5 = scmp.ne.s32.totalorder %s20_s19, %s1232_s3  ;;  %p1238_p7 = scmp.lt.s32.totalorder %s1232_s3, %s1232_s3 }
  0x2f   :  { %p1239_p8 = por %p1238_p7, %p1237_p6 }
  0x31   :  { %p1240_p9 = pnand %p1239_p8, %p1233_p5 }
  0x33   :  { %1243 = shalt.err (!%p1240_p9)
}
  0x34   :  { %25 = dma.hbm_to_vmem [thread:$0]  %s1525_s0, 128, %s20_s19, [#allocation3], %s1320_s30, %s1320_s30, %s1321_s6  }
  0x35   :  { %s1244_s10 = scalar_lea.hbm %s1527_s2, 16 }
  0x36   :  { %p1245_p10 = scmp.ne.s32.totalorder %s1527_s2, %s1244_s10  ;;  %p1248_p11 = scmp.lt.u32.totalorder %s1244_s10, %s1527_s2 }
  0x38   :  { %p1250_p12 = pnand %p1248_p11, %p1245_p10 }
  0x3a   :  { %1253 = shalt.err (!%p1250_p12)
}
  0x3b   :  { %s1254_s15 = scalar_lea.vmem %s45_s22, 16  ;;  %s1258_s16 = scalar_lea.vmem %s45_s22, 32 }
  0x3c   :  { %p1255_p13 = scmp.ne.s32.totalorder %s45_s22, %s1254_s15  ;;  %p1259_p0 = scmp.lt.s32.totalorder %s45_s22, %s45_s22 }
  0x3d   :  { %p1260_p1 = scmp.lt.s32.totalorder %s1258_s16, %s1254_s15 }
  0x3f   :  { %p1261_p2 = por %p1260_p1, %p1259_p0 }
  0x41   :  { %p1262_p3 = pnand %p1261_p2, %p1255_p13 }
  0x43   :  { %1265 = shalt.err (!%p1262_p3)
}
  0x44   :  { %47 = dma.hbm_to_vmem [thread:$0]  %s1527_s2, 16, %s45_s22, [#allocation6]  }
  0x45   :  { %s1324_s6 = smov [#allocation10]   ;;  %s1266_s19 = scalar_lea.hbm %s1529_s4, 16 }
  0x46   :  { %s66_s1 = sshll.u32 %s1324_s6, 4  ;;  %p1267_p4 = scmp.ne.s32.totalorder %s1529_s4, %s1266_s19  ;;  %s67_s1 = int_to_ptr.vmem [resolvable:$true] %s66_s1 }
  0x47   :  { %p1270_p5 = scmp.lt.u32.totalorder %s1266_s19, %s1529_s4 }
  0x49   :  { %p1272_p6 = pnand %p1270_p5, %p1267_p4 }
  0x4b   :  { %1275 = shalt.err (!%p1272_p6)
}
  0x4c   :  { %s1276_s26 = scalar_lea.vmem %s67_s1, 16  ;;  %s1280_s2 = scalar_lea.vmem %s67_s1, 32 }
  0x4d   :  { %p1277_p7 = scmp.ne.s32.totalorder %s67_s1, %s1276_s26  ;;  %p1281_p8 = scmp.lt.s32.totalorder %s67_s1, %s67_s1 }
  0x4e   :  { %p1282_p9 = scmp.lt.s32.totalorder %s1280_s2, %s1276_s26 }
  0x50   :  { %p1283_p10 = por %p1282_p9, %p1281_p8 }
  0x52   :  { %p1284_p11 = pnand %p1283_p10, %p1277_p7 }
  0x54   :  { %1287 = shalt.err (!%p1284_p11)
}
  0x55   :  { %69 = dma.hbm_to_vmem [thread:$0]  %s1529_s4, 16, %s67_s1, [#allocation9]  }
  0x56   :  { %1310 = dma.done.wait [#allocation3], 128  }
  0x57   :  { %1311 = vsyncadd [#allocation3], 4294967168 }
  0x58   :  { %1312 = dma.done.wait [#allocation6], 272  }
  0x59   :  { %1313 = vsyncadd [#allocation6], 4294967024 }
  0x5a   :  { %1314 = dma.done.wait [#allocation9], 1040  }
  0x5b   :  { %1315 = vsyncadd [#allocation9], 4294966256  ;;  %v1325_v0 = vmov 0.0   ;;  %vm1326_vm0 = vmmov 0   ;;  %v1159_v1 = vld [vmem:[#allocation5] sm:$0xff]   ;;  %v1160_v2 = vld [vmem:[#allocation5 + $0x8] sm:$0xff]  }
  0x5c   :  { %1047 = vmatprep.subr.bf16.mxu0 %v1325_v0  ;;  %1051 = vmatprep.mubr.msk.bf16.mxu0 %vm1326_vm0, %v1325_v0  ;;  %v86_v3 = vld [vmem:[#allocation2] sm:$0xf]  ;;  %v87_v4 = vld [vmem:[#allocation2 + $0x4] sm:$0xf]  ;;  %vm116_vm1 = vcmask 261120   ;;  %vm229_vm2 = vcmask 1043456  }
  0x5d   :  { %1055 = vmatprep.subr.bf16.mxu1 %v1325_v0  ;;  %1057 = vmatprep.mubr.msk.bf16.mxu1 %vm1326_vm0, %v1325_v0  ;;  %v991_v5 = vcombine.low %v86_v3, %v87_v4  ;;  %v1449_v6 = vsel %vm229_vm2, %v86_v3, 0  ;;  %v990_v7 = vld [vmem:[#allocation7] ss:$0 sm:$0xff]  ;;  %vm161_vm3 = vcmask 130048   ;;  %v1458_v39 = vsel %vm229_vm2, %v87_v4, 0  ;;  %s1327_s4 = smov 124  }
  0x5e   :  { %1048 = vmatpush3.bf16.msra.mxu0 %v1159_v1  ;;  %1056 = vmatpush3.bf16.msra.mxu1 %v1449_v6  ;;  %s1328_s28 = smov 120   ;;  %vm225_vm4 = vcmask 64512   ;;  %s1329_s29 = smov 116   ;;  %v1162_v61 = vld [vmem:[#allocation8] sm:$0xff]   ;;  %v1163_v62 = vld [vmem:[#allocation8 + $0x8] sm:$0xff]  }
  0x5f   :  { %1049 = vmatprep.subr.bf16.mxu0 %v1325_v0  ;;  %1061 = vmatprep.subr.bf16.mxu1 %v1325_v0  ;;  %s1330_s3 = smov [#allocation11]  }
  0x60   :  { %s979_s21 = sshll.u32 %s1330_s3, 4  ;;  %s980_s21 = int_to_ptr.vmem [resolvable:$true] %s979_s21 }
  0x61   :  { %s1288_s7 = scalar_lea.vmem %s980_s21, 128  ;;  %p1293_p13 = scmp.lt.s32.totalorder %s980_s21, %s980_s21 }
  0x62   :  { %1050 = vmatpush3.bf16.msra.mxu0 %v1160_v2  ;;  %p1289_p12 = scmp.ne.s32.totalorder %s980_s21, %s1288_s7  ;;  %p1294_p0 = scmp.lt.s32.totalorder %s1288_s7, %s1288_s7 }
  0x63   :  { %1081 = vmatprep.subr.bf16.mxu0 %v1325_v0 }
  0x64   :  { %p1295_p1 = por %p1294_p0, %p1293_p13 }
  0x65   :  { %1052 = vmatmul.mubr.msk.bf16.vlgmr.msra.gmra.mrb[0].mxu0 %vm116_vm1, %v991_v5 }
  0x66   :  { %1083 = vmatprep.mubr.msk.bf16.mxu0 %vm1326_vm0, %v1325_v0  ;;  %1082 = vmatpush3.bf16.msra.mxu0 %v1458_v39  ;;  %p1296_p2 = pnand %p1295_p1, %p1289_p12 }
  0x67   :  { %1087 = vmatprep.subr.bf16.mxu0 %v1325_v0 }
 0x138   :  { %v154_v8 = vpop.f32.mrb[0].mxu0 }
 0x139   :  { %v155_v9 = vadd.f32 %v990_v7, %v154_v8  ;;  %v1053_v10 = vpop.f32.mrb[1].mxu0 }
 0x13a   :  { %v157_v11 = vpop.f32.mrb[2].mxu0 }
 0x13b   :  { %v162_v12 = vsel %vm161_vm3, %v155_v9, -inf  ;;  %v158_v13 = vadd.f32 %v990_v7, %v157_v11  ;;  %v1054_v14 = vpop.f32.mrb[3].mxu0 }
 0x13c   :  { %v163_v15 = vrot.slane %v162_v12, 4 }
 0x13d   :  { %v169_v16 = vsel %vm161_vm3, %v158_v13, -inf }
 0x13e   :  { %v164_v17 = vmax.f32 %v162_v12, %v163_v15  ;;  %v170_v18 = vrot.slane %v169_v16, 4 }
 0x140   :  { %v165_v19 = vrot.slane %v164_v17, 2  ;;  %v171_v20 = vmax.f32 %v169_v16, %v170_v18  ;;  %v1165_v18 = vld [vmem:[#allocation8 + $0x18] sm:$0xff]  }
 0x142   :  { %v166_v21 = vmax.f32 %v164_v17, %v165_v19  ;;  %v172_v22 = vrot.slane %v171_v20, 2  ;;  %v1164_v17 = vld [vmem:[#allocation8 + $0x10] sm:$0xff]  }
 0x144   :  { %v167_v23 = vrot.slane %v166_v21, 1  ;;  %v173_v24 = vmax.f32 %v171_v20, %v172_v22 }
 0x146   :  { %v168_v25 = vmax.f32 %v166_v21, %v167_v23  ;;  %v174_v26 = vrot.slane %v173_v24, 1 }
 0x148   :  { %v176_v27 = vsub.f32 %v155_v9, %v168_v25  ;;  %v175_v28 = vmax.f32 %v173_v24, %v174_v26 }
 0x14a   :  { %v178_v29 = vmul.f32 1.442695, %v176_v27  ;;  %v177_v30 = vsub.f32 %v158_v13, %v175_v28 }
 0x14c   :  { %1170 = vpow2.f32 %v178_v29  ;;  %v180_v31 = vmul.f32 1.442695, %v177_v30 }
 0x14e   :  { %1172 = vpow2.f32 %v180_v31  ;;  %v1166_v31 = vld [vmem:[#allocation8 + $0x20] sm:$0xff]  }
 0x156   :  { %v1171_v32 = vpop.eup %1170 }
 0x157   :  { %v182_v33 = vsel %vm161_vm3, %v1171_v32, 0.0 }
 0x158   :  { %v1173_v34 = vpop.eup %1172  ;;  %v183_v35 = vrot.slane %v182_v33, 4 }
 0x159   :  { %v189_v36 = vsel %vm161_vm3, %v1173_v34, 0.0 }
 0x15a   :  { %v184_v37 = vadd.f32 %v183_v35, %v182_v33  ;;  %v190_v38 = vrot.slane %v189_v36, 4 }
 0x15c   :  { %v185_v40 = vrot.slane %v184_v37, 2  ;;  %v191_v41 = vadd.f32 %v190_v38, %v189_v36 }
 0x15e   :  { %v186_v42 = vadd.f32 %v185_v40, %v184_v37  ;;  %v192_v43 = vrot.slane %v191_v41, 2 }
 0x160   :  { %v187_v44 = vrot.slane %v186_v42, 1  ;;  %v193_v45 = vadd.f32 %v192_v43, %v191_v41 }
 0x162   :  { %v188_v46 = vadd.f32 %v187_v44, %v186_v42  ;;  %v194_v47 = vrot.slane %v193_v45, 1 }
 0x164   :  { %1174 = vrcp.f32 %v188_v46  ;;  %v195_v48 = vadd.f32 %v194_v47, %v193_v45  ;;  %v1168_v47 = vld [vmem:[#allocation8 + $0x30] sm:$0xff]  }
 0x166   :  { %1176 = vrcp.f32 %v195_v48 }
 0x16e   :  { %v1175_v49 = vpop.eup %1174 }
 0x16f   :  { %v198_v50 = vmul.f32 %v1175_v49, %v1171_v32 }
 0x170   :  { %v1177_v51 = vpop.eup %1176 }
 0x171   :  { %v200_v52 = vpack.c.bf16 %v198_v50, %v198_v50  ;;  %v199_v53 = vmul.f32 %v1177_v51, %v1173_v34  ;;  %v1167_v34 = vld [vmem:[#allocation8 + $0x28] sm:$0xff]  }
 0x173   :  { %401 = vrot.lane.b32.xlu1 %v200_v52, %s1327_s4  ;;  %209 = vxpose.xlu0.c.b16.start.end [1/1] (short) (narrow) %v200_v52, 16  ;;  %v201_v54 = vpack.c.bf16 %v199_v53, %v199_v53 }
 0x177   :  { %464 = vrot.lane.b32.xlu1 %v201_v54, %s1327_s4  ;;  %273 = vxpose.xlu0.c.b16.start.end [1/1] (short) (narrow) %v201_v54, 16 }
 0x17b   :  { %654 = vrot.lane.b32.xlu1 %v201_v54, %s1328_s28 }
 0x180   :  { %592 = vrot.lane.b32.xlu0 %v200_v52, %s1328_s28 }
 0x1d9   :  { %v217_v55 = vpop.trf.xlu0 }
 0x1da   :  { %1058 = vmatmul.mubr.msk.bf16.vlgmr.msra.gmra.mrb[0].mxu1 %vm225_vm4, %v217_v55 }
 0x1db   :  { %1062 = vmatpush3.bf16.msra.mxu1 %v1458_v39  ;;  %1063 = vmatprep.mubr.msk.bf16.mxu1 %vm1326_vm0, %v1325_v0 }
 0x1dc   :  { %1067 = vmatprep.subr.bf16.mxu1 %v1325_v0 }
 0x1dd   :  { %v281_v56 = vpop.trf.xlu0 }
 0x1e2   :  { %1064 = vmatmul.mubr.msk.bf16.vlgmr.msra.gmra.mrb[4].mxu1 %vm225_vm4, %v281_v56 }
 0x1e3   :  { %1071 = vmatprep.mubr.msk.bf16.mxu1 %vm1326_vm0, %v1325_v0  ;;  %1068 = vmatpush3.bf16.msra.mxu1 %v1162_v61 }
 0x1e4   :  { %1069 = vmatprep.subr.bf16.mxu1 %v1325_v0 }
 0x1e5   :  { %v402_v57 = vpop.permute.xlu1 %401 }
 0x1e6   :  { %404 = vxpose.xlu1.c.b16.start.end [1/1] (short) (narrow) %v402_v57, 16 }
 0x1e7   :  { %1070 = vmatpush3.bf16.msra.mxu1 %v1163_v62 }
 0x1e8   :  { %1075 = vmatprep.subr.bf16.mxu1 %v1325_v0 }
 0x1e9   :  { %v465_v58 = vpop.permute.xlu1 %464 }
 0x1ea   :  { %467 = vxpose.xlu0.c.b16.start.end [1/1] (short) (narrow) %v465_v58, 16  ;;  %v995_v58 = vld [vmem:[#allocation10] ss:$0 sm:$0xff] }
 0x1ed   :  { %v655_v59 = vpop.permute.xlu1 %654 }
 0x1ee   :  { %657 = vxpose.xlu1.c.b16.start.end [1/1] (short) (narrow) %v655_v59, 16 }
 0x1f2   :  { %844 = vrot.lane.b32.xlu1 %v201_v54, %s1329_s29  ;;  %v593_v60 = vpop.permute.xlu0 %592 }
 0x1f3   :  { %595 = vxpose.xlu0.c.b16.start.end [1/1] (short) (narrow) %v593_v60, 16 }
 0x1fc   :  { %782 = vrot.lane.b32.xlu0 %v200_v52, %s1329_s29 }
 0x24c   :  { %v412_v1 = vpop.trf.xlu1 }
 0x250   :  { %v475_v63 = vpop.trf.xlu0 }
 0x251   :  { %1084 = vmatmul.mubr.msk.bf16.vlgmr.msra.gmra.mrb[4].mxu0 %vm225_vm4, %v475_v63 }
 0x252   :  { %1091 = vmatprep.mubr.msk.bf16.mxu0 %vm1326_vm0, %v1325_v0  ;;  %1088 = vmatpush3.bf16.msra.mxu0 %v1164_v17 }
 0x253   :  { %1089 = vmatprep.subr.bf16.mxu0 %v1325_v0 }
 0x254   :  { %v665_v2 = vpop.trf.xlu1 }
 0x256   :  { %1090 = vmatpush3.bf16.msra.mxu0 %v1165_v18 }
 0x257   :  { %1107 = vmatprep.subr.bf16.mxu0 %v1325_v0 }
 0x259   :  { %v603_v4 = vpop.trf.xlu0 }
 0x264   :  { %v845_v3 = vpop.permute.xlu1 %844 }
 0x265   :  { %847 = vxpose.xlu0.c.b16.start.end [1/1] (short) (narrow) %v845_v3, 16 }
 0x26e   :  { %v783_v5 = vpop.permute.xlu0 %782 }
 0x26f   :  { %785 = vxpose.xlu1.c.b16.start.end [1/1] (short) (narrow) %v783_v5, 16 }
 0x2ad   :  { %v267_v7 = vpop.f32.mrb[0].mxu1 }
 0x2ae   :  { %v1059_v8 = vpop.f32.mrb[1].mxu1 }
 0x2af   :  { %v270_v9 = vpop.f32.mrb[2].mxu1 }
 0x2b0   :  { %v1060_v10 = vpop.f32.mrb[3].mxu1 }
 0x2b5   :  { %v329_v11 = vpop.f32.mrb[4].mxu1 }
 0x2b6   :  { %v337_v12 = vcombine.low %v267_v7, %v329_v11  ;;  %v1065_v13 = vpop.f32.mrb[5].mxu1 }
 0x2b7   :  { %v332_v14 = vpop.f32.mrb[6].mxu1 }
 0x2b8   :  { %v339_v15 = vpack.c.bf16 %v337_v12, %v337_v12  ;;  %v1066_v16 = vpop.f32.mrb[7].mxu1 }
 0x2ba   :  { %1072 = vmatmul.mubr.msk.bf16.vlgmr.msra.gmra.mrb[8].mxu1 %vm116_vm1, %v339_v15 }
 0x2bb   :  { %1076 = vmatpush3.bf16.msra.mxu1 %v1449_v6  ;;  %1077 = vmatprep.mubr.msk.bf16.mxu1 %vm1326_vm0, %v1325_v0 }
 0x2bc   :  { %1095 = vmatprep.subr.bf16.mxu1 %v1325_v0 }
 0x2c2   :  { %1078 = vmatmul.mubr.msk.bf16.vlgmr.msra.gmra.mrb[12].mxu1 %vm225_vm4, %v412_v1 }
 0x2c3   :  { %1096 = vmatpush3.bf16.msra.mxu1 %v1449_v6  ;;  %1097 = vmatprep.mubr.msk.bf16.mxu1 %vm1326_vm0, %v1325_v0 }
 0x2c4   :  { %1101 = vmatprep.subr.bf16.mxu1 %v1325_v0 }
 0x2ca   :  { %1098 = vmatmul.mubr.msk.bf16.vlgmr.msra.gmra.mrb[16].mxu1 %vm225_vm4, %v603_v4 }
 0x2cb   :  { %1102 = vmatpush3.bf16.msra.mxu1 %v1458_v39  ;;  %1103 = vmatprep.mubr.msk.bf16.mxu1 %vm1326_vm0, %v1325_v0  ;;  %v855_v46 = vpop.trf.xlu0 }
 0x2cc   :  { %1115 = vmatprep.subr.bf16.mxu1 %v1325_v0 }
 0x2d2   :  { %1104 = vmatmul.mubr.msk.bf16.vlgmr.msra.gmra.mrb[20].mxu1 %vm225_vm4, %v665_v2 }
 0x2d3   :  { %1116 = vmatpush3.bf16.msra.mxu1 %v1449_v6  ;;  %1117 = vmatprep.mubr.msk.bf16.mxu1 %vm1326_vm0, %v1325_v0 }
 0x2d5   :  { %v793_v23 = vpop.trf.xlu1 }
 0x2da   :  { %1118 = vmatmul.mubr.msk.bf16.vlgmr.msra.gmra.mrb[24].mxu1 %vm225_vm4, %v793_v23 }
 0x324   :  { %v520_v19 = vpop.f32.mrb[4].mxu0 }
 0x325   :  { %v1085_v20 = vpop.f32.mrb[5].mxu0 }
 0x326   :  { %v523_v21 = vpop.f32.mrb[6].mxu0 }
 0x327   :  { %v1086_v22 = vpop.f32.mrb[7].mxu0 }
 0x38d   :  { %v393_v24 = vpop.f32.mrb[8].mxu1 }
 0x38e   :  { %v1073_v6 = vpop.f32.mrb[9].mxu1  ;;  %v399_v59 = vadd.f32 %v995_v58, %v393_v24 }
 0x38f   :  { %v396_v25 = vpop.f32.mrb[10].mxu1 }
 0x390   :  { %v1074_v26 = vpop.f32.mrb[11].mxu1 }
 0x395   :  { %v457_v27 = vpop.f32.mrb[12].mxu1 }
 0x396   :  { %v528_v28 = vcombine.low %v457_v27, %v520_v19  ;;  %v1079_v29 = vpop.f32.mrb[13].mxu1 }
 0x397   :  { %v460_v30 = vpop.f32.mrb[14].mxu1 }
 0x398   :  { %v530_v32 = vpack.c.bf16 %v528_v28, %v528_v28  ;;  %v1080_v33 = vpop.f32.mrb[15].mxu1 }
 0x39a   :  { %1092 = vmatmul.mubr.msk.bf16.vlgmr.msra.gmra.mrb[8].mxu0 %vm116_vm1, %v530_v32 }
 0x39b   :  { %1108 = vmatpush3.bf16.msra.mxu0 %v1166_v31  ;;  %1111 = vmatprep.mubr.msk.bf16.mxu0 %vm1326_vm0, %v1325_v0 }
 0x39c   :  { %1109 = vmatprep.subr.bf16.mxu0 %v1325_v0 }
 0x39d   :  { %v648_v35 = vpop.f32.mrb[16].mxu1 }
 0x39e   :  { %v1099_v36 = vpop.f32.mrb[17].mxu1 }
 0x39f   :  { %v651_v37 = vpop.f32.mrb[18].mxu1  ;;  %1110 = vmatpush3.bf16.msra.mxu0 %v1167_v34 }
 0x3a0   :  { %v1100_v38 = vpop.f32.mrb[19].mxu1  ;;  %1121 = vmatprep.subr.bf16.mxu0 %v1325_v0 }
 0x3a5   :  { %v710_v40 = vpop.f32.mrb[20].mxu1 }
 0x3a6   :  { %v718_v41 = vcombine.low %v648_v35, %v710_v40  ;;  %v1105_v42 = vpop.f32.mrb[21].mxu1 }
 0x3a7   :  { %v713_v43 = vpop.f32.mrb[22].mxu1 }
 0x3a8   :  { %v720_v44 = vpack.c.bf16 %v718_v41, %v718_v41  ;;  %v1106_v45 = vpop.f32.mrb[23].mxu1 }
 0x3aa   :  { %1112 = vmatmul.mubr.msk.bf16.vlgmr.msra.gmra.mrb[8].mxu0 %vm116_vm1, %v720_v44 }
 0x3ab   :  { %1122 = vmatpush3.bf16.msra.mxu0 %v1458_v39  ;;  %1123 = vmatprep.mubr.msk.bf16.mxu0 %vm1326_vm0, %v1325_v0  ;;  %v1169_v39 = vld [vmem:[#allocation8 + $0x38] sm:$0xff]  }
 0x3ac   :  { %1127 = vmatprep.subr.bf16.mxu0 %v1325_v0 }
 0x3ad   :  { %v838_v48 = vpop.f32.mrb[24].mxu1 }
 0x3ae   :  { %v1119_v49 = vpop.f32.mrb[25].mxu1 }
 0x3af   :  { %v841_v50 = vpop.f32.mrb[26].mxu1 }
 0x3b0   :  { %v1120_v51 = vpop.f32.mrb[27].mxu1 }
 0x3b2   :  { %1124 = vmatmul.mubr.msk.bf16.vlgmr.msra.gmra.mrb[12].mxu0 %vm225_vm4, %v855_v46 }
 0x3b3   :  { %1128 = vmatpush3.bf16.msra.mxu0 %v1168_v47  ;;  %1131 = vmatprep.mubr.msk.bf16.mxu0 %vm1326_vm0, %v1325_v0 }
 0x3b4   :  { %1129 = vmatprep.subr.bf16.mxu0 %v1325_v0 }
 0x3b7   :  { %1130 = vmatpush3.bf16.msra.mxu0 %v1169_v39 }
 0x485   :  { %v900_v52 = vpop.f32.mrb[12].mxu0 }
 0x486   :  { %v908_v53 = vcombine.low %v838_v48, %v900_v52  ;;  %v1125_v54 = vpop.f32.mrb[13].mxu0 }
 0x487   :  { %v903_v55 = vpop.f32.mrb[14].mxu0 }
 0x488   :  { %v910_v56 = vpack.c.bf16 %v908_v53, %v908_v53  ;;  %v1126_v57 = vpop.f32.mrb[15].mxu0 }
 0x48a   :  { %1132 = vmatmul.mubr.msk.bf16.vlgmr.msra.gmra.mrb[8].mxu0 %vm116_vm1, %v910_v56 }
 0x55d   :  { %v965_v60 = vpop.f32.mrb[8].mxu0 }
 0x55e   :  { %v1136_v0 = vadd.f32 %v965_v60, %v399_v59  ;;  %v1133_v61 = vpop.f32.mrb[9].mxu0 }
 0x55f   :  { %v968_v62 = vpop.f32.mrb[10].mxu0 }
 0x560   :  { %972 = vst.msk [vmem:[#allocation11] sm:$0xff] %vm116_vm1, %v1136_v0  ;;  %v1134_v63 = vpop.f32.mrb[11].mxu0 }
 0x561   :  { %1299 = shalt.err (!%p1296_p2)
}
 0x562   :  { %s1300_s10 = scalar_lea.hbm %s1530_s5, 128 }
 0x563   :  { %p1301_p3 = scmp.ne.s32.totalorder %s1530_s5, %s1300_s10  ;;  %p1304_p4 = scmp.lt.u32.totalorder %s1300_s10, %s1530_s5 }
 0x565   :  { %p1306_p5 = pnand %p1304_p4, %p1301_p3 }
 0x567   :  { %1309 = shalt.err (!%p1306_p5)
}
 0x568   :  { %982 = dma.vmem_to_hbm [thread:$0]  %s980_s21, 128, %s1530_s5, [#allocation4]  }
 0x569   :  { %1316 = dma.done.wait [#allocation4], 128  }
 0x56a   :  { %1317 = vsyncadd [#allocation4], 4294967168 }
 0x56b   :  { %986 = vsyncpa [#allocation3], 1 }
 0x56c   :  { %987 = vsyncpa [#allocation6], 1 }
 0x56d   :  { %988 = vsyncpa [#allocation9], 1 }
 0x56e   :  { %989 = vsyncpa [#allocation4], 1 }

</bundles_post_ra>
